<compile_context>
chip_gen: v6e
topology: v6e:2x2x1
jax: 0.10.0
libtpu: 0.0.40
codegen_flags: <defaults>
</compile_context>

<pallas_src>
import functools

import jax
import jax.numpy as jnp
from jax.experimental import pallas as pl
from jax.experimental.pallas import tpu as pltpu

# Conservative per-grid-step working-set budget: fits the default scoped VMEM
# limit on v6e/v7x (32 MiB) with headroom for double-buffering, and is far
# below v7x's 64 MiB physical VMEM.
_VMEM_BUDGET_BYTES = 20 << 20
_VMEM_LIMIT_CAP = 48 << 20
_SMALL_TOTAL_BYTES = 4 << 20  # below this, a single grid step wins outright


def _divisors(n):
    return [d for d in range(1, n + 1) if n % d == 0]


def _vmem_limit(est_bytes):
    return int(min(_VMEM_LIMIT_CAP, max(32 << 20, 2 * est_bytes)))


# ---------------------------------------------------------------------------
# Fast path: fused single-pass kernel (full S resident per batch tile).
# ---------------------------------------------------------------------------
def _add_norm_fused_kernel(x_ref, y_ref, g_ref, b_ref, o_ref, *, eps):
    # x_ref, y_ref, o_ref: (bt, S, E)   g_ref, b_ref: (1, E)
    added = x_ref[...] + y_ref[...]
    if added.dtype != jnp.float32:
        added = added.astype(jnp.float32)                       # stats in f32
    mean = jnp.mean(added, axis=1, keepdims=True)                # (bt, 1, E)
    centered = added - mean
    var = jnp.mean(centered * centered, axis=1, keepdims=True)   # biased var
    scale = jax.lax.rsqrt(var + eps) * g_ref[...]                # fold affine
    o_ref[...] = (centered * scale + b_ref[...]).astype(o_ref.dtype)


# ---------------------------------------------------------------------------
# Fallback path: S-tiled accumulation (pass 1) + normalize (pass 2).
# ---------------------------------------------------------------------------
def _stats_kernel(x_ref, y_ref, g_ref, b_ref, scale_ref, shift_ref, *, eps, seq_len):
    # x_ref, y_ref: (1, s_tile, E)   scale_ref, shift_ref: (1, 1, E), resident
    # across the S grid axis (same block index), used as sum / sumsq
    # accumulators and finalized into scale / shift on the last step.
    s = pl.program_id(1)
    added = x_ref[...] + y_ref[...]
    if added.dtype != jnp.float32:
        added = added.astype(jnp.float32)

    @pl.when(s == 0)
    def _():
        scale_ref[...] = jnp.zeros_like(scale_ref)
        shift_ref[...] = jnp.zeros_like(shift_ref)

    scale_ref[...] += jnp.sum(added, axis=1, keepdims=True)           # sum
    shift_ref[...] += jnp.sum(added * added, axis=1, keepdims=True)   # sumsq

    @pl.when(s == pl.num_programs(1) - 1)
    def _():
        inv_n = 1.0 / float(seq_len)
        mean = scale_ref[...] * inv_n
        var = jnp.maximum(shift_ref[...] * inv_n - mean * mean, 0.0)  # biased
        scale = jax.lax.rsqrt(var + eps) * g_ref[...]
        scale_ref[...] = scale
        shift_ref[...] = b_ref[...] - mean * scale


def _normalize_kernel(x_ref, y_ref, scale_ref, shift_ref, o_ref):
    added = x_ref[...] + y_ref[...]
    if added.dtype != jnp.float32:
        added = added.astype(jnp.float32)
    o_ref[...] = (added * scale_ref[...] + shift_ref[...]).astype(o_ref.dtype)


# ---------------------------------------------------------------------------
# Tiling heuristics.
# ---------------------------------------------------------------------------
def _fused_per_batch_bytes(S, E, in_item, out_item):
    # 2 inputs + 1 output, each double-buffered, plus ~2 f32 temporaries
    # (added / centered) held by the compiler.
    return S * E * (2 * 2 * in_item + 2 * out_item + 2 * 4)


def _pick_batch_tile(B, per_b_bytes, total_hbm_bytes, budget_bytes):
    """Largest divisor of B whose fused working set fits the VMEM budget.

    Returns 0 if even a single batch row does not fit (use the S-tiled path).
    """
    max_bt = budget_bytes // per_b_bytes
    if max_bt < 1:
        return 0
    if max_bt >= B:
        # Whole problem fits.  Tiny totals: one step (per-step overhead and
        # fixed DMA latency dominate).  Otherwise keep >= 2 steps so the
        # "parallel" batch axis can shard across TensorCores (v7x megacore).
        if B == 1 or total_hbm_bytes <= _SMALL_TOTAL_BYTES:
            return B
        smaller = [d for d in _divisors(B) if d < B]
        return max(smaller) if smaller else B
    return max(d for d in _divisors(B) if d <= max_bt)


def _pick_s_tile(S, E, in_item, out_item, budget_bytes):
    def per_row(st):
        return st * E * (2 * 2 * in_item + 2 * out_item + 2 * 4)

    # Prefer S tiles that are multiples of 8 (sublane-aligned) and divide S.
    cands = [d for d in _divisors(S) if d % 8 == 0] or _divisors(S)
    fitting = [d for d in cands if per_row(d) <= budget_bytes]
    return max(fitting) if fitting else min(cands)


# ---------------------------------------------------------------------------
# Public wrapper.
# ---------------------------------------------------------------------------
def add_and_norm(input1, input2, gamma, beta, *, eps=1e-5, batch_tile=None,
                 vmem_budget_bytes=_VMEM_BUDGET_BYTES):
    """input1, input2: (B, S, E).  gamma, beta: (E,) InstanceNorm affine params."""
    assert input1.shape == input2.shape
    B, S, E = input1.shape
    out_dtype = input1.dtype
    in_item = jnp.dtype(input1.dtype).itemsize
    out_item = jnp.dtype(out_dtype).itemsize

    gamma2d = gamma.reshape(1, E).astype(jnp.float32)
    beta2d = beta.reshape(1, E).astype(jnp.float32)

    per_b = _fused_per_batch_bytes(S, E, in_item, out_item)
    total_hbm = B * S * E * (2 * in_item + out_item)

    if batch_tile is None:
        batch_tile = _pick_batch_tile(B, per_b, total_hbm, vmem_budget_bytes)
    else:
        assert B % batch_tile == 0, "batch must be divisible by batch_tile"

    if batch_tile >= 1:
        # ---------------- fused single-pass path ----------------
        est = batch_tile * per_b
        kernel = functools.partial(_add_norm_fused_kernel, eps=eps)
        return pl.pallas_call(
            kernel,
            out_shape=jax.ShapeDtypeStruct((B, S, E), out_dtype),
            grid_spec=pltpu.PrefetchScalarGridSpec(
                num_scalar_prefetch=0,
                grid=(B // batch_tile,),
                in_specs=[
                    pl.BlockSpec((batch_tile, S, E), lambda i: (i, 0, 0)),
                    pl.BlockSpec((batch_tile, S, E), lambda i: (i, 0, 0)),
                    pl.BlockSpec((1, E), lambda i: (0, 0)),   # gamma (resident)
                    pl.BlockSpec((1, E), lambda i: (0, 0)),   # beta  (resident)
                ],
                out_specs=pl.BlockSpec((batch_tile, S, E), lambda i: (i, 0, 0)),
            ),
            compiler_params=pltpu.CompilerParams(
                dimension_semantics=("parallel",),
                vmem_limit_bytes=_vmem_limit(est)),
        )(input1, input2, gamma2d, beta2d)

    # ---------------- S-tiled fallback path (huge S*E) ----------------
    s_tile = _pick_s_tile(S, E, in_item, out_item, vmem_budget_bytes)
    assert S % s_tile == 0
    n_s = S // s_tile
    est = s_tile * E * (2 * 2 * in_item + 2 * out_item + 2 * 4)
    vmem_limit = _vmem_limit(est)

    # Pass 1: per-(b, e) statistics -> scale / shift (B, 1, E) in f32.
    scale, shift = pl.pallas_call(
        functools.partial(_stats_kernel, eps=eps, seq_len=S),
        out_shape=(jax.ShapeDtypeStruct((B, 1, E), jnp.float32),
                   jax.ShapeDtypeStruct((B, 1, E), jnp.float32)),
        grid_spec=pltpu.PrefetchScalarGridSpec(
            num_scalar_prefetch=0,
            grid=(B, n_s),
            in_specs=[
                pl.BlockSpec((1, s_tile, E), lambda b, s: (b, s, 0)),
                pl.BlockSpec((1, s_tile, E), lambda b, s: (b, s, 0)),
                pl.BlockSpec((1, E), lambda b, s: (0, 0)),
                pl.BlockSpec((1, E), lambda b, s: (0, 0)),
            ],
            out_specs=[
                pl.BlockSpec((1, 1, E), lambda b, s: (b, 0, 0)),
                pl.BlockSpec((1, 1, E), lambda b, s: (b, 0, 0)),
            ],
        ),
        compiler_params=pltpu.CompilerParams(
            dimension_semantics=("parallel", "arbitrary"),
            vmem_limit_bytes=vmem_limit),
    )(input1, input2, gamma2d, beta2d)

    # Pass 2: normalize tile-by-tile with the folded scale / shift.
    return pl.pallas_call(
        _normalize_kernel,
        out_shape=jax.ShapeDtypeStruct((B, S, E), out_dtype),
        grid_spec=pltpu.PrefetchScalarGridSpec(
            num_scalar_prefetch=0,
            grid=(B, n_s),
            in_specs=[
                pl.BlockSpec((1, s_tile, E), lambda b, s: (b, s, 0)),
                pl.BlockSpec((1, s_tile, E), lambda b, s: (b, s, 0)),
                pl.BlockSpec((1, 1, E), lambda b, s: (b, 0, 0)),
                pl.BlockSpec((1, 1, E), lambda b, s: (b, 0, 0)),
            ],
            out_specs=pl.BlockSpec((1, s_tile, E), lambda b, s: (b, s, 0)),
        ),
        compiler_params=pltpu.CompilerParams(
            dimension_semantics=("parallel", "parallel"),
            vmem_limit_bytes=vmem_limit),
    )(input1, input2, scale, shift)


if __name__ == "__main__":
    # Small shapes consistent with the POMO model: (batch, problem/seq, embedding),
    # embedding_dim=128 keeps the lane axis dense (full 128-lane stores).
    batch, seq, embedding_dim = 4, 16, 128
    eps = 1e-5

    key = jax.random.PRNGKey(0)
    k1, k2, kg, kb = jax.random.split(key, 4)

    input1 = jax.random.normal(k1, (batch, seq, embedding_dim), dtype=jnp.float32)
    input2 = jax.random.normal(k2, (batch, seq, embedding_dim), dtype=jnp.float32)
    # InstanceNorm1d(affine=True) parameters (PyTorch inits to 1/0; random here
    # to exercise the affine fold).
    gamma = 1.0 + 0.1 * jax.random.normal(kg, (embedding_dim,), jnp.float32)
    beta = 0.1 * jax.random.normal(kb, (embedding_dim,), jnp.float32)

    # Pure-JAX reference (same semantics as the PyTorch module: add, transpose,
    # InstanceNorm1d over the seq axis per (batch, channel), transpose back).
    added = input1 + input2
    mean = added.mean(axis=1, keepdims=True)
    var = ((added - mean) ** 2).mean(axis=1, keepdims=True)        # biased var
    ref = (added - mean) / jnp.sqrt(var + eps) * gamma + beta

    # Fast fused path (auto tile: single grid step at this tiny size).
    y = jax.block_until_ready(add_and_norm(input1, input2, gamma, beta, eps=eps))
    assert y.shape == input1.shape
    assert jnp.allclose(y, ref, atol=1e-5, rtol=1e-5), float(jnp.max(jnp.abs(y - ref)))

    # Exercise the S-tiled fallback path too (forced via a tiny VMEM budget).
    y2 = jax.block_until_ready(
        add_and_norm(input1, input2, gamma, beta, eps=eps, vmem_budget_bytes=1))
    assert jnp.allclose(y2, ref, atol=1e-4, rtol=1e-4), float(jnp.max(jnp.abs(y2 - ref)))

    print("KERNEL_OK")
</pallas_src>

<mosaic_0001>
module attributes {stable_mosaic.version = 11 : i64} {
  func.func @_add_norm_fused_kernel(%arg0: i32, %arg1: memref<4x16x128xf32, #tpu.memory_space<vmem>>, %arg2: memref<4x16x128xf32, #tpu.memory_space<vmem>>, %arg3: memref<1x128xf32, #tpu.memory_space<vmem>>, %arg4: memref<1x128xf32, #tpu.memory_space<vmem>>, %arg5: memref<4x16x128xf32, #tpu.memory_space<vmem>>) attributes {dimension_semantics = [#tpu.dimension_semantics<parallel>], iteration_bounds = array<i64: 1>, scalar_prefetch = 0 : i64, scratch_operands = 0 : i64, tpu.core_type = #tpu.core_type<tc>, window_params = [{transform_indices = @transform_0, window_bounds = array<i64: 4, 16, 128>}, {transform_indices = @transform_1, window_bounds = array<i64: 4, 16, 128>}, {pipeline_mode = #tpu.pipeline_mode<synchronous>, transform_indices = @transform_2, window_bounds = array<i64: 1, 128>}, {pipeline_mode = #tpu.pipeline_mode<synchronous>, transform_indices = @transform_3, window_bounds = array<i64: 1, 128>}, {transform_indices = @transform_4, window_bounds = array<i64: 4, 16, 128>}]} {
    %c0 = arith.constant 0 : index
    %c0_0 = arith.constant 0 : index
    %c0_1 = arith.constant 0 : index
    %0 = vector.load %arg1[%c0, %c0_0, %c0_1] : memref<4x16x128xf32, #tpu.memory_space<vmem>>, vector<4x16x128xf32>
    %c0_2 = arith.constant 0 : index
    %c0_3 = arith.constant 0 : index
    %c0_4 = arith.constant 0 : index
    %1 = vector.load %arg2[%c0_2, %c0_3, %c0_4] : memref<4x16x128xf32, #tpu.memory_space<vmem>>, vector<4x16x128xf32>
    %2 = arith.addf %0, %1 : vector<4x16x128xf32>
    %cst = arith.constant dense<0.000000e+00> : vector<4x128xf32>
    %3 = vector.multi_reduction <add>, %2, %cst [1] : vector<4x16x128xf32> to vector<4x128xf32>
    %4 = vector.shape_cast %3 : vector<4x128xf32> to vector<4x1x128xf32>
    %cst_5 = arith.constant 1.600000e+01 : f32
    %5 = vector.broadcast %cst_5 : f32 to vector<4x1x128xf32>
    %6 = arith.divf %4, %5 : vector<4x1x128xf32>
    %7 = vector.broadcast %6 : vector<4x1x128xf32> to vector<4x16x128xf32>
    %8 = arith.subf %2, %7 : vector<4x16x128xf32>
    %9 = arith.mulf %8, %8 : vector<4x16x128xf32>
    %cst_6 = arith.constant dense<0.000000e+00> : vector<4x128xf32>
    %10 = vector.multi_reduction <add>, %9, %cst_6 [1] : vector<4x16x128xf32> to vector<4x128xf32>
    %11 = vector.shape_cast %10 : vector<4x128xf32> to vector<4x1x128xf32>
    %cst_7 = arith.constant 1.600000e+01 : f32
    %12 = vector.broadcast %cst_7 : f32 to vector<4x1x128xf32>
    %13 = arith.divf %11, %12 : vector<4x1x128xf32>
    %cst_8 = arith.constant 9.99999974E-6 : f32
    %14 = vector.broadcast %cst_8 : f32 to vector<4x1x128xf32>
    %15 = arith.addf %13, %14 : vector<4x1x128xf32>
    %16 = math.rsqrt %15 : vector<4x1x128xf32>
    %c0_9 = arith.constant 0 : index
    %c0_10 = arith.constant 0 : index
    %17 = vector.load %arg3[%c0_9, %c0_10] : memref<1x128xf32, #tpu.memory_space<vmem>>, vector<1x128xf32>
    %18 = vector.shape_cast %17 : vector<1x128xf32> to vector<1x1x128xf32>
    %19 = vector.broadcast %18 : vector<1x1x128xf32> to vector<4x1x128xf32>
    %20 = arith.mulf %16, %19 : vector<4x1x128xf32>
    %21 = vector.broadcast %20 : vector<4x1x128xf32> to vector<4x16x128xf32>
    %22 = arith.mulf %8, %21 : vector<4x16x128xf32>
    %c0_11 = arith.constant 0 : index
    %c0_12 = arith.constant 0 : index
    %23 = vector.load %arg4[%c0_11, %c0_12] : memref<1x128xf32, #tpu.memory_space<vmem>>, vector<1x128xf32>
    %24 = vector.shape_cast %23 : vector<1x128xf32> to vector<1x1x128xf32>
    %25 = vector.broadcast %24 : vector<1x1x128xf32> to vector<4x16x128xf32>
    %26 = arith.addf %22, %25 : vector<4x16x128xf32>
    %c0_13 = arith.constant 0 : index
    %c0_14 = arith.constant 0 : index
    %c0_15 = arith.constant 0 : index
    %27 = vector.load %arg5[%c0_13, %c0_14, %c0_15] : memref<4x16x128xf32, #tpu.memory_space<vmem>>, vector<4x16x128xf32>
    tpu.vector_store %arg5[%c0_13, %c0_14, %c0_15], %26 {strides = array<i32>} : memref<4x16x128xf32, #tpu.memory_space<vmem>>, vector<4x16x128xf32>,
    return
  }
  func.func @transform_0(%arg0: i32) -> (i32, i32, i32) {
    %c0_i32 = arith.constant 0 : i32
    %c0_i32_0 = arith.constant 0 : i32
    %c0_i32_1 = arith.constant 0 : i32
    return %arg0, %c0_i32, %c0_i32_0 : i32, i32, i32
  }
  func.func @transform_1(%arg0: i32) -> (i32, i32, i32) {
    %c0_i32 = arith.constant 0 : i32
    %c0_i32_0 = arith.constant 0 : i32
    %c0_i32_1 = arith.constant 0 : i32
    return %arg0, %c0_i32, %c0_i32_0 : i32, i32, i32
  }
  func.func @transform_2(%arg0: i32) -> (i32, i32) {
    %c0_i32 = arith.constant 0 : i32
    %c0_i32_0 = arith.constant 0 : i32
    %c0_i32_1 = arith.constant 0 : i32
    return %c0_i32, %c0_i32_0 : i32, i32
  }
  func.func @transform_3(%arg0: i32) -> (i32, i32) {
    %c0_i32 = arith.constant 0 : i32
    %c0_i32_0 = arith.constant 0 : i32
    %c0_i32_1 = arith.constant 0 : i32
    return %c0_i32, %c0_i32_0 : i32, i32
  }
  func.func @transform_4(%arg0: i32) -> (i32, i32, i32) {
    %c0_i32 = arith.constant 0 : i32
    %c0_i32_0 = arith.constant 0 : i32
    %c0_i32_1 = arith.constant 0 : i32
    return %arg0, %c0_i32, %c0_i32_0 : i32, i32, i32
  }
}

</mosaic_0001>

<bundles_post_ra>
// kernel: tpu_custom_call.1
= control target key start
LH: loop header
LB: loop body
LE: loop exit
PB: predicated region body
PF: predicated region fallthrough
CT: control target
= control target key end

     0   :  { %9 = vsyncpa [#allocation3], 0  ;;  %s403_s0 = inlined_call_operand.hbm [shape: f32[4,16,128], index: 0, kind: input, shape index: {}]   ;;  %s404_s1 = inlined_call_operand.hbm [shape: f32[4,16,128], index: 1, kind: input, shape index: {}]   ;;  %s405_s2 = inlined_call_operand.vmem [shape: f32[1,128], index: 2, kind: input, shape index: {}]   ;;  %s406_s3 = inlined_call_operand.vmem [shape: f32[1,128], index: 3, kind: input, shape index: {}]   ;;  %s407_s4 = inlined_call_operand.hbm [shape: f32[4,16,128], index: 4, kind: output, shape index: {}]  }
   0x1   :  { %10 = vsyncpa [#allocation6], 0 }
   0x2   :  { %11 = vsyncpa [#allocation4], 0  ;;  %s309_s15 = smov [#allocation2]  }
   0x3   :  { %s17_s16 = sshll.u32 %s309_s15, 4  ;;  %s18_s16 = int_to_ptr.vmem [resolvable:$true] %s17_s16 }
   0x4   :  { %s251_s17 = scalar_lea.vmem %s18_s16, 1024  ;;  %p256_p1 = scmp.lt.s32.totalorder %s18_s16, %s18_s16 }
   0x5   :  { %p252_p0 = scmp.ne.s32.totalorder %s18_s16, %s251_s17  ;;  %p257_p2 = scmp.lt.s32.totalorder %s251_s17, %s251_s17 }
   0x7   :  { %p258_p3 = por %p257_p2, %p256_p1 }
   0x9   :  { %p259_p4 = pnand %p258_p3, %p252_p0 }
   0xb   :  { %262 = shalt.err (!%p259_p4)
}
   0xc   :  { %s310_s18 = smov 128   ;;  %s311_s19 = smov 8  }
   0xd   :  { %23 = dma.hbm_to_vmem [thread:$0]  %s403_s0, 1024, %s18_s16, [#allocation3], %s310_s18, %s310_s18, %s311_s19  }
   0xe   :  { %s312_s22 = smov [#allocation5]  }
   0xf   :  { %s29_s23 = sshll.u32 %s312_s22, 4  ;;  %s30_s23 = int_to_ptr.vmem [resolvable:$true] %s29_s23 }
  0x10   :  { %s271_s24 = scalar_lea.vmem %s30_s23, 1024  ;;  %p276_p6 = scmp.lt.s32.totalorder %s30_s23, %s30_s23 }
  0x11   :  { %p272_p5 = scmp.ne.s32.totalorder %s30_s23, %s271_s24  ;;  %p277_p7 = scmp.lt.s32.totalorder %s271_s24, %s271_s24 }
  0x13   :  { %p278_p8 = por %p277_p7, %p276_p6 }
  0x15   :  { %p279_p9 = pnand %p278_p8, %p272_p5 }
  0x17   :  { %282 = shalt.err (!%p279_p9)
}
  0x18   :  { %35 = dma.hbm_to_vmem [thread:$0]  %s404_s1, 1024, %s30_s23, [#allocation6], %s310_s18, %s310_s18, %s311_s19  }
  0x19   :  { %303 = dma.done.wait [#allocation3], 1024  }
  0x1a   :  { %304 = vsyncadd [#allocation3], 4294966272 }
  0x1b   :  { %305 = dma.done.wait [#allocation6], 1024  }
  0x1c   :  { %306 = vsyncadd [#allocation6], 4294966272  ;;  %v46_v0 = vld [vmem:[#allocation2] sm:$0xff]  ;;  %v47_v1 = vld [vmem:[#allocation2 + $0x8] sm:$0xff] }
  0x1d   :  { %v54_v2 = vld [vmem:[#allocation5] sm:$0xff]  ;;  %v55_v3 = vld [vmem:[#allocation5 + $0x8] sm:$0xff]  ;;  %v48_v6 = vld [vmem:[#allocation2 + $0x10] sm:$0xff] }
  0x1e   :  { %v62_v4 = vadd.f32 %v54_v2, %v46_v0  ;;  %v63_v5 = vadd.f32 %v55_v3, %v47_v1  ;;  %v49_v7 = vld [vmem:[#allocation2 + $0x18] sm:$0xff]  ;;  %v56_v8 = vld [vmem:[#allocation5 + $0x10] sm:$0xff]  ;;  %v50_v11 = vld [vmem:[#allocation2 + $0x20] sm:$0xff] }
  0x1f   :  { %v57_v9 = vld [vmem:[#allocation5 + $0x18] sm:$0xff]  ;;  %v64_v10 = vadd.f32 %v56_v8, %v48_v6  ;;  %v51_v12 = vld [vmem:[#allocation2 + $0x28] sm:$0xff]  ;;  %v58_v15 = vld [vmem:[#allocation5 + $0x20] sm:$0xff] }
  0x20   :  { %v70_v13 = vadd.f32 %v63_v5, %v62_v4  ;;  %v65_v14 = vadd.f32 %v57_v9, %v49_v7  ;;  %v59_v16 = vld [vmem:[#allocation5 + $0x28] sm:$0xff]  ;;  %v52_v17 = vld [vmem:[#allocation2 + $0x30] sm:$0xff]  ;;  %v66_v18 = vadd.f32 %v58_v15, %v50_v11  ;;  %v53_v20 = vld [vmem:[#allocation2 + $0x38] sm:$0xff] }
  0x21   :  { %v67_v19 = vadd.f32 %v59_v16, %v51_v12  ;;  %v60_v21 = vld [vmem:[#allocation5 + $0x30] sm:$0xff]  ;;  %v61_v22 = vld [vmem:[#allocation5 + $0x38] sm:$0xff] }
  0x22   :  { %v71_v23 = vrot.slane %v70_v13, 4  ;;  %v77_v24 = vadd.f32 %v65_v14, %v64_v10  ;;  %v68_v25 = vadd.f32 %v60_v21, %v52_v17  ;;  %v69_v26 = vadd.f32 %v61_v22, %v53_v20 }
  0x23   :  { %v84_v27 = vadd.f32 %v67_v19, %v66_v18 }
  0x24   :  { %v72_v28 = vadd.f32 %v71_v23, %v70_v13  ;;  %v78_v29 = vrot.slane %v77_v24, 4  ;;  %v91_v30 = vadd.f32 %v69_v26, %v68_v25 }
  0x25   :  { %v85_v31 = vrot.slane %v84_v27, 4 }
  0x26   :  { %v73_v32 = vrot.slane %v72_v28, 2  ;;  %v79_v33 = vadd.f32 %v78_v29, %v77_v24  ;;  %v92_v34 = vrot.slane %v91_v30, 4 }
  0x27   :  { %v86_v35 = vadd.f32 %v85_v31, %v84_v27 }
  0x28   :  { %v74_v36 = vadd.f32 %v73_v32, %v72_v28  ;;  %v80_v37 = vrot.slane %v79_v33, 2  ;;  %v93_v38 = vadd.f32 %v92_v34, %v91_v30 }
  0x29   :  { %v87_v39 = vrot.slane %v86_v35, 2 }
  0x2a   :  { %v75_v40 = vrot.slane %v74_v36, 1  ;;  %v81_v41 = vadd.f32 %v80_v37, %v79_v33  ;;  %v94_v42 = vrot.slane %v93_v38, 2 }
  0x2b   :  { %v88_v43 = vadd.f32 %v87_v39, %v86_v35 }
  0x2c   :  { %v76_v44 = vadd.f32 %v75_v40, %v74_v36  ;;  %v82_v45 = vrot.slane %v81_v41, 1  ;;  %v95_v46 = vadd.f32 %v94_v42, %v93_v38 }
  0x2d   :  { %v89_v47 = vrot.slane %v88_v43, 1 }
  0x2e   :  { %v99_v48 = vmul.f32 0.0625, %v76_v44  ;;  %v83_v49 = vadd.f32 %v82_v45, %v81_v41  ;;  %v96_v50 = vrot.slane %v95_v46, 1  ;;  %v164_v44 = vlaneseq }
  0x2f   :  { %v90_v51 = vadd.f32 %v89_v47, %v88_v43 }
  0x30   :  { %v351_v52 = vsub.f32 %v62_v4, %v99_v48  ;;  %v353_v53 = vsub.f32 %v63_v5, %v99_v48  ;;  %v100_v54 = vmul.f32 0.0625, %v83_v49  ;;  %v97_v55 = vadd.f32 %v96_v50, %v95_v46  ;;  %v159_v46 = vld [vmem:[%s405_s2] sm:$0x1]  ;;  %s313_s2 = smov [#allocation7]  }
  0x31   :  { %v101_v56 = vmul.f32 0.0625, %v90_v51  ;;  %v165_v45 = vshrl.u32 %v164_v44, 7 }
  0x32   :  { %v111_v57 = vmul.f32 %v351_v52, %v351_v52  ;;  %v112_v58 = vmul.f32 %v353_v53, %v353_v53  ;;  %v359_v59 = vsub.f32 %v64_v10, %v100_v54  ;;  %v361_v60 = vsub.f32 %v65_v14, %v100_v54 }
  0x33   :  { %v363_v61 = vsub.f32 %v66_v18, %v101_v56  ;;  %v365_v62 = vsub.f32 %v67_v19, %v101_v56  ;;  %v102_v63 = vmul.f32 0.0625, %v97_v55  ;;  %v166_v47 = vsub.s32 0, %v165_v45  ;;  %v229_v56 = vld [vmem:[%s406_s3] ss:$0 sm:$0xff]  ;;  %s216_s3 = sshll.u32 %s313_s2, 4  ;;  %s217_s3 = int_to_ptr.vmem [resolvable:$true] %s216_s3 }
  0x34   :  { %v119_v0 = vadd.f32 %v112_v58, %v111_v57  ;;  %v113_v1 = vmul.f32 %v359_v59, %v359_v59  ;;  %v114_v2 = vmul.f32 %v361_v60, %v361_v60  ;;  %s283_s29 = scalar_lea.vmem %s217_s3, 1024  ;;  %p288_p11 = scmp.lt.s32.totalorder %s217_s3, %s217_s3 }
  0x35   :  { %v115_v3 = vmul.f32 %v363_v61, %v363_v61  ;;  %v116_v4 = vmul.f32 %v365_v62, %v365_v62  ;;  %v375_v5 = vsub.f32 %v68_v25, %v102_v63  ;;  %v377_v6 = vsub.f32 %v69_v26, %v102_v63  ;;  %p284_p10 = scmp.ne.s32.totalorder %s217_s3, %s283_s29  ;;  %p289_p12 = scmp.lt.s32.totalorder %s283_s29, %s283_s29 }
  0x36   :  { %v120_v7 = vrot.slane %v119_v0, 4  ;;  %v126_v8 = vadd.f32 %v114_v2, %v113_v1 }
  0x37   :  { %v133_v9 = vadd.f32 %v116_v4, %v115_v3  ;;  %v117_v10 = vmul.f32 %v375_v5, %v375_v5  ;;  %v118_v11 = vmul.f32 %v377_v6, %v377_v6  ;;  %p290_p13 = por %p289_p12, %p288_p11 }
  0x38   :  { %v121_v12 = vadd.f32 %v120_v7, %v119_v0  ;;  %v127_v13 = vrot.slane %v126_v8, 4 }
  0x39   :  { %v134_v14 = vrot.slane %v133_v9, 4  ;;  %v140_v15 = vadd.f32 %v118_v11, %v117_v10  ;;  %p291_p0 = pnand %p290_p13, %p284_p10 }
  0x3a   :  { %v122_v16 = vrot.slane %v121_v12, 2  ;;  %v128_v17 = vadd.f32 %v127_v13, %v126_v8 }
  0x3b   :  { %v135_v18 = vadd.f32 %v134_v14, %v133_v9  ;;  %v141_v19 = vrot.slane %v140_v15, 4 }
  0x3c   :  { %v123_v20 = vadd.f32 %v122_v16, %v121_v12  ;;  %v129_v21 = vrot.slane %v128_v17, 2 }
  0x3d   :  { %v136_v22 = vrot.slane %v135_v18, 2  ;;  %v142_v23 = vadd.f32 %v141_v19, %v140_v15 }
  0x3e   :  { %v124_v24 = vrot.slane %v123_v20, 1  ;;  %v130_v25 = vadd.f32 %v129_v21, %v128_v17 }
  0x3f   :  { %v137_v26 = vadd.f32 %v136_v22, %v135_v18  ;;  %v143_v27 = vrot.slane %v142_v23, 2 }
  0x40   :  { %v125_v28 = vadd.f32 %v124_v24, %v123_v20  ;;  %v131_v29 = vrot.slane %v130_v25, 1 }
  0x41   :  { %v138_v30 = vrot.slane %v137_v26, 1  ;;  %v144_v31 = vadd.f32 %v143_v27, %v142_v23 }
  0x42   :  { %v147_v32 = vmul.f32 0.0625, %v125_v28  ;;  %v132_v33 = vadd.f32 %v131_v29, %v130_v25 }
  0x43   :  { %v139_v34 = vadd.f32 %v138_v30, %v137_v26  ;;  %v145_v35 = vrot.slane %v144_v31, 1 }
  0x44   :  { %v151_v36 = vadd.f32 1e-05, %v147_v32  ;;  %v148_v37 = vmul.f32 0.0625, %v132_v33 }
  0x45   :  { %v149_v38 = vmul.f32 0.0625, %v139_v34  ;;  %v146_v39 = vadd.f32 %v145_v35, %v144_v31 }
  0x46   :  { %235 = vrsqrt.f32 %v151_v36  ;;  %v152_v40 = vadd.f32 1e-05, %v148_v37 }
  0x47   :  { %v153_v41 = vadd.f32 1e-05, %v149_v38  ;;  %v150_v42 = vmul.f32 0.0625, %v146_v39 }
  0x48   :  { %237 = vrsqrt.f32 %v152_v40 }
  0x49   :  { %239 = vrsqrt.f32 %v153_v41  ;;  %v154_v43 = vadd.f32 1e-05, %v150_v42 }
  0x4b   :  { %241 = vrsqrt.f32 %v154_v43 }
  0x53   :  { %v236_v48 = vpop.eup %235 }
  0x54   :  { %v160_v49 = vmul.f32 %v236_v48, %v159_v46 }
  0x55   :  { %v238_v50 = vpop.eup %237 }
  0x56   :  { %v240_v51 = vpop.eup %239  ;;  %v167_v54 = vrot.slane %v160_v49, %v166_v47  ;;  %v161_v55 = vmul.f32 %v238_v50, %v159_v46 }
  0x57   :  { %v162_v57 = vmul.f32 %v240_v51, %v159_v46 }
  0x58   :  { %v242_v58 = vpop.eup %241  ;;  %v180_v63 = vmul.f32 %v167_v54, %v351_v52  ;;  %v181_v0 = vmul.f32 %v167_v54, %v353_v53  ;;  %v171_v1 = vrot.slane %v161_v55, %v166_v47 }
  0x59   :  { %v175_v2 = vrot.slane %v162_v57, %v166_v47  ;;  %v163_v3 = vmul.f32 %v242_v58, %v159_v46 }
  0x5a   :  { %v195_v4 = vadd.f32 %v229_v56, %v180_v63  ;;  %v196_v7 = vadd.f32 %v229_v56, %v181_v0  ;;  %v182_v8 = vmul.f32 %v171_v1, %v359_v59  ;;  %v183_v9 = vmul.f32 %v171_v1, %v361_v60 }
  0x5b   :  { %v184_v10 = vmul.f32 %v175_v2, %v363_v61  ;;  %v185_v11 = vmul.f32 %v175_v2, %v365_v62  ;;  %v179_v12 = vrot.slane %v163_v3, %v166_v47 }
  0x5c   :  { %203 = vst [vmem:[#allocation7] sm:$0xff] %v195_v4  ;;  %204 = vst [vmem:[#allocation7 + $0x8] sm:$0xff] %v196_v7  ;;  %v197_v13 = vadd.f32 %v229_v56, %v182_v8  ;;  %v198_v52 = vadd.f32 %v229_v56, %v183_v9 }
  0x5d   :  { %v199_v53 = vadd.f32 %v229_v56, %v184_v10  ;;  %v200_v14 = vadd.f32 %v229_v56, %v185_v11  ;;  %v186_v15 = vmul.f32 %v179_v12, %v375_v5  ;;  %v187_v16 = vmul.f32 %v179_v12, %v377_v6 }
  0x5e   :  { %205 = vst [vmem:[#allocation7 + $0x10] sm:$0xff] %v197_v13  ;;  %206 = vst [vmem:[#allocation7 + $0x18] sm:$0xff] %v198_v52 }
  0x5f   :  { %207 = vst [vmem:[#allocation7 + $0x20] sm:$0xff] %v199_v53  ;;  %208 = vst [vmem:[#allocation7 + $0x28] sm:$0xff] %v200_v14  ;;  %v201_v59 = vadd.f32 %v229_v56, %v186_v15  ;;  %v202_v60 = vadd.f32 %v229_v56, %v187_v16 }
  0x61   :  { %209 = vst [vmem:[#allocation7 + $0x30] sm:$0xff] %v201_v59  ;;  %210 = vst [vmem:[#allocation7 + $0x38] sm:$0xff] %v202_v60 }
  0x62   :  { %294 = shalt.err (!%p291_p0)
}
  0x63   :  { %222 = dma.vmem_to_hbm [thread:$0]  %s217_s3, 1024, %s407_s4, [#allocation4], %s310_s18, %s310_s18, %s311_s19  }
  0x64   :  { %307 = dma.done.wait [#allocation4], 1024  }
  0x65   :  { %308 = vsyncadd [#allocation4], 4294966272 }
  0x66   :  { %226 = vsyncpa [#allocation3], 1 }
  0x67   :  { %227 = vsyncpa [#allocation6], 1 }
  0x68   :  { %228 = vsyncpa [#allocation4], 1 }

</bundles_post_ra>
